<compile_context>
chip_gen: v6e
topology: v6e:2x2x1
jax: 0.10.0
libtpu: 0.0.40
codegen_flags: <defaults>
</compile_context>

<pallas_src>
import functools

import jax
import jax.numpy as jnp
from jax.experimental import pallas as pl
from jax.experimental.pallas import tpu as pltpu

_LANE = 128


def _ceil_div(a, b):
    return -(-a // b)


def _round_up(a, m):
    return _ceil_div(a, m) * m


def _sqrt_kernel(x_ref, o_ref):
    # Elementwise hot path: one EUP/VPU sqrt over the whole VMEM tile.
    o_ref[...] = jnp.sqrt(x_ref[...])


@functools.lru_cache(maxsize=1)
def _tpu_config():
    """Return (target_tile_bytes, small_bytes, vmem_cap_bytes, two_tensorcores)."""
    vmem_cap = 128 << 20
    kind = ""
    try:
        vmem_cap = int(pltpu.get_tpu_info().vmem_capacity_bytes)
    except Exception:
        pass
    try:
        kind = jax.devices()[0].device_kind.lower()
    except Exception:
        pass
    if vmem_cap <= (64 << 20) or "v7" in kind:
        # v7x: 3.2 TB/s HBM -> big tiles amortize the ~0.35us/step cost, but
        # only 64 MiB physical VMEM and 2 TensorCores per chip.
        target, small, two_tc = 8 << 20, 2 << 20, True
    elif "v6" in kind:
        target, small, two_tc = 6 << 20, 1 << 20, False
    else:
        # v5e or unknown: conservative tile, single TensorCore.
        target, small, two_tc = 4 << 20, 1 << 20, False
    # Keep 4x tile (double-buffered in+out) well under physical VMEM.
    target = min(target, vmem_cap // 8)
    return target, small, vmem_cap, two_tc


def _choose_layout(n, sub):
    """Pick a copy-free lane-dense 2D factoring (rows, cols) of n, or None."""
    if n % _LANE != 0:
        return None
    for cols in (2048, 1024, 512, 256, _LANE):
        if n % cols == 0 and (n // cols) % sub == 0:
            return n // cols, cols
    return None


def _choose_tile_rows(rows, cols, itemsize, sub, target_tile_bytes, two_tc):
    """Fixed, MiB-scale tile; a ragged (masked) tail block is accepted."""
    row_bytes = cols * itemsize
    max_tile = max(sub, (target_tile_bytes // row_bytes) // sub * sub)
    if rows <= max_tile:
        if two_tc and rows >= 2 * sub:
            # v7x only: split the slab so both TensorCores get a block
            # (grid axis is "parallel"). On 1-TC chips the extra step would be
            # pure overhead, so keep a single block there.
            return _round_up(_ceil_div(rows, 2), sub)
        return rows
    tile = max_tile
    if two_tc:
        steps = _ceil_div(rows, tile)
        if steps > 1 and steps % 2 == 1:
            # Prefer an even step count so the two TensorCores stay balanced.
            cand = max(sub, min(tile, _round_up(_ceil_div(rows, steps + 1), sub)))
            if _ceil_div(rows, cand) % 2 == 0:
                tile = cand
    return tile


def _pallas_sqrt_2d(x2d, tile_rows, vmem_cap):
    rows, cols = x2d.shape
    itemsize = jnp.dtype(x2d.dtype).itemsize
    n = rows * cols
    tile_bytes = tile_rows * cols * itemsize
    # Double-buffered input + output = 4x tile; add slack, stay under physical.
    vmem_limit = int(min(max(4 * tile_bytes + (2 << 20), 16 << 20),
                         vmem_cap - (4 << 20)))
    grid = (pl.cdiv(rows, tile_rows),)
    return pl.pallas_call(
        _sqrt_kernel,
        out_shape=jax.ShapeDtypeStruct((rows, cols), x2d.dtype),
        grid_spec=pltpu.PrefetchScalarGridSpec(
            num_scalar_prefetch=0,
            grid=grid,
            in_specs=[pl.BlockSpec((tile_rows, cols), lambda i: (i, 0))],
            out_specs=pl.BlockSpec((tile_rows, cols), lambda i: (i, 0)),
        ),
        compiler_params=pltpu.CompilerParams(
            dimension_semantics=("parallel",),
            vmem_limit_bytes=vmem_limit,
        ),
        cost_estimate=pl.CostEstimate(
            flops=n, transcendentals=n, bytes_accessed=2 * n * itemsize),
    )(x2d)


def normalize_layer(x, *, force_pallas=False, _target_tile_bytes=None):
    """Pallas implementation of NormalizeLayer.forward: X.sqrt()."""
    orig_shape = x.shape
    dtype = x.dtype

    # torch's .sqrt() on non-float promotes; keep that on the XLA path.
    if not jnp.issubdtype(dtype, jnp.floating):
        return jnp.sqrt(x)

    itemsize = jnp.dtype(dtype).itemsize
    n = x.size
    sub = max(8, 32 // itemsize)  # native sublane tile: f32->8, bf16->16, fp8->32

    target_tile_bytes, small_bytes, vmem_cap, two_tc = _tpu_config()
    if _target_tile_bytes is not None:  # test hook: force multi-step / ragged grids
        target_tile_bytes = _target_tile_bytes

    if n == 0 or ((not force_pallas) and n * itemsize < small_bytes):
        # Tiny input: launch/DMA overhead loses to XLA's fused sqrt.
        return jnp.sqrt(x)

    layout = _choose_layout(n, sub)
    if layout is None:
        # No copy-free lane-dense factoring; a padded Pallas path would add
        # full extra HBM copies on an HBM-bound op, so XLA wins here.
        return jnp.sqrt(x)

    rows, cols = layout
    x2d = x.reshape(rows, cols)  # contiguous -> no-copy reshape
    tile_rows = _choose_tile_rows(rows, cols, itemsize, sub,
                                  target_tile_bytes, two_tc)
    out2d = _pallas_sqrt_2d(x2d, tile_rows, vmem_cap)
    return out2d.reshape(orig_shape)


if __name__ == "__main__":
    key = jax.random.PRNGKey(0)

    # 1) Small NCHW feature map consistent with the conv net; force the Pallas
    #    path so the kernel itself is exercised.
    x = jax.random.uniform(
        key, (2, 4, 16, 16), dtype=jnp.float32, minval=0.0, maxval=4.0
    )
    y = normalize_layer(x, force_pallas=True)
    jax.block_until_ready(y)
    assert y.shape == x.shape and y.dtype == x.dtype
    assert jnp.allclose(y, jnp.sqrt(x), atol=1e-6, rtol=1e-6)

    # 2) Larger map (single big block on 1-TC chips, split across 2 TCs on v7x).
    x2 = jax.random.uniform(
        jax.random.PRNGKey(0), (2, 8, 32, 128), dtype=jnp.float32,
        minval=0.0, maxval=4.0,
    )
    y2 = normalize_layer(x2, force_pallas=True)
    jax.block_until_ready(y2)
    assert y2.shape == x2.shape and y2.dtype == x2.dtype
    assert jnp.allclose(y2, jnp.sqrt(x2), atol=1e-6, rtol=1e-6)

    # 3) Non-divisible shape: tiny forced tile -> multi-step grid with a ragged
    #    (masked) last block, exercising the partial-store path.
    x3 = jax.random.uniform(
        jax.random.PRNGKey(0), (2, 4, 24, 128), dtype=jnp.float32,
        minval=0.0, maxval=4.0,
    )
    y3 = normalize_layer(x3, force_pallas=True, _target_tile_bytes=64 * 1024)
    jax.block_until_ready(y3)
    assert y3.shape == x3.shape and y3.dtype == x3.dtype
    assert jnp.allclose(y3, jnp.sqrt(x3), atol=1e-6, rtol=1e-6)

    print("KERNEL_OK")
</pallas_src>

<mosaic_0001>
module attributes {stable_mosaic.version = 11 : i64} {
  func.func @_sqrt_kernel(%arg0: i32, %arg1: memref<8x256xf32, #tpu.memory_space<vmem>>, %arg2: memref<8x256xf32, #tpu.memory_space<vmem>>) attributes {dimension_semantics = [#tpu.dimension_semantics<parallel>], iteration_bounds = array<i64: 1>, scalar_prefetch = 0 : i64, scratch_operands = 0 : i64, tpu.core_type = #tpu.core_type<tc>, window_params = [{transform_indices = @transform_0, window_bounds = array<i64: 8, 256>}, {transform_indices = @transform_1, window_bounds = array<i64: 8, 256>}]} {
    %c0 = arith.constant 0 : index
    %c0_0 = arith.constant 0 : index
    %0 = vector.load %arg1[%c0, %c0_0] : memref<8x256xf32, #tpu.memory_space<vmem>>, vector<8x256xf32>
    %1 = math.sqrt %0 : vector<8x256xf32>
    %c0_1 = arith.constant 0 : index
    %c0_2 = arith.constant 0 : index
    %2 = vector.load %arg2[%c0_1, %c0_2] : memref<8x256xf32, #tpu.memory_space<vmem>>, vector<8x256xf32>
    tpu.vector_store %arg2[%c0_1, %c0_2], %1 {strides = array<i32>} : memref<8x256xf32, #tpu.memory_space<vmem>>, vector<8x256xf32>,
    return
  }
  func.func @transform_0(%arg0: i32) -> (i32, i32) {
    %c0_i32 = arith.constant 0 : i32
    %c0_i32_0 = arith.constant 0 : i32
    return %arg0, %c0_i32 : i32, i32
  }
  func.func @transform_1(%arg0: i32) -> (i32, i32) {
    %c0_i32 = arith.constant 0 : i32
    %c0_i32_0 = arith.constant 0 : i32
    return %arg0, %c0_i32 : i32, i32
  }
}

</mosaic_0001>

<bundles_post_ra>
// kernel: tpu_custom_call.1
= control target key start
LH: loop header
LB: loop body
LE: loop exit
PB: predicated region body
PF: predicated region fallthrough
CT: control target
= control target key end

     0   :  { %6 = vsyncpa [#allocation3], 0  ;;  %s122_s0 = inlined_call_operand.hbm [shape: f32[8,256], index: 0, kind: input, shape index: {}]   ;;  %s123_s1 = inlined_call_operand.hbm [shape: f32[8,256], index: 1, kind: output, shape index: {}]  }
   0x1   :  { %7 = vsyncpa [#allocation4], 0  ;;  %s104_s6 = smov [#allocation2]  }
   0x2   :  { %s14_s7 = sshll.u32 %s104_s6, 4  ;;  %s15_s7 = int_to_ptr.vmem [resolvable:$true] %s14_s7 }
   0x3   :  { %s68_s8 = scalar_lea.vmem %s15_s7, 256  ;;  %p73_p1 = scmp.lt.s32.totalorder %s15_s7, %s15_s7 }
   0x4   :  { %p69_p0 = scmp.ne.s32.totalorder %s15_s7, %s68_s8  ;;  %p74_p2 = scmp.lt.s32.totalorder %s68_s8, %s68_s8 }
   0x6   :  { %p75_p3 = por %p74_p2, %p73_p1 }
   0x8   :  { %p76_p4 = pnand %p75_p3, %p69_p0 }
   0xa   :  { %79 = shalt.err (!%p76_p4)
}
   0xb   :  { %17 = dma.hbm_to_vmem [thread:$0]  %s122_s0, 256, %s15_s7, [#allocation3]  }
   0xc   :  { %100 = dma.done.wait [#allocation3], 256  }
   0xd   :  { %101 = vsyncadd [#allocation3], 4294967040  ;;  %v21_v0 = vld [vmem:[#allocation2] sm:$0xff]  ;;  %v22_v1 = vld [vmem:[#allocation2 + $0x8] sm:$0xff]  ;;  %s105_s11 = smov [#allocation5]  }
   0xe   :  { %56 = vrsqrt.f32 %v21_v0  ;;  %vm25_vm0 = vcmp.eq.f32.partialorder %v21_v0, inf  ;;  %v28_v3 = vand.u32 2147483648, %v21_v0  ;;  %vm27_vm1 = vcmp.eq.f32.partialorder %v21_v0, 0.0  ;;  %s45_s12 = sshll.u32 %s105_s11, 4  ;;  %s46_s12 = int_to_ptr.vmem [resolvable:$true] %s45_s12 }
   0xf   :  { %58 = vrsqrt.f32 %v22_v1  ;;  %vm32_vm2 = vcmp.eq.f32.partialorder %v22_v1, inf  ;;  %v35_v6 = vand.u32 2147483648, %v22_v1  ;;  %vm34_vm3 = vcmp.eq.f32.partialorder %v22_v1, 0.0  ;;  %s80_s0 = scalar_lea.vmem %s46_s12, 256  ;;  %p85_p6 = scmp.lt.s32.totalorder %s46_s12, %s46_s12 }
  0x10   :  { %p81_p5 = scmp.ne.s32.totalorder %s46_s12, %s80_s0  ;;  %p86_p7 = scmp.lt.s32.totalorder %s80_s0, %s80_s0 }
  0x12   :  { %p87_p8 = por %p86_p7, %p85_p6 }
  0x14   :  { %p88_p9 = pnand %p87_p8, %p81_p5 }
  0x1b   :  { %v57_v2 = vpop.eup %56 }
  0x1c   :  { %v59_v4 = vpop.eup %58  ;;  %v24_v5 = vmul.f32 %v57_v2, %v21_v0 }
  0x1d   :  { %v31_v7 = vmul.f32 %v59_v4, %v22_v1 }
  0x1e   :  { %v26_v8 = vsel %vm25_vm0, %v21_v0, %v24_v5 }
  0x1f   :  { %v29_v9 = vsel %vm27_vm1, %v28_v3, %v26_v8  ;;  %v33_v10 = vsel %vm32_vm2, %v22_v1, %v31_v7 }
  0x20   :  { %37 = vst [vmem:[#allocation5] sm:$0xff] %v29_v9  ;;  %v36_v11 = vsel %vm34_vm3, %v35_v6, %v33_v10 }
  0x21   :  { %38 = vst [vmem:[#allocation5 + $0x8] sm:$0xff] %v36_v11 }
  0x22   :  { %91 = shalt.err (!%p88_p9)
}
  0x23   :  { %48 = dma.vmem_to_hbm [thread:$0]  %s46_s12, 256, %s123_s1, [#allocation4]  }
  0x24   :  { %102 = dma.done.wait [#allocation4], 256  }
  0x25   :  { %103 = vsyncadd [#allocation4], 4294967040 }
  0x26   :  { %52 = vsyncpa [#allocation3], 1 }
  0x27   :  { %53 = vsyncpa [#allocation4], 1 }

</bundles_post_ra>
